<compile_context>
chip_gen: v5e
topology: v5e:2x2
jax: 0.10.0
libtpu: 0.0.40
codegen_flags: <defaults>
</compile_context>

<pallas_src>
import functools

import jax
import jax.numpy as jnp
from jax import lax
from jax.experimental import pallas as pl
from jax.experimental.pallas import tpu as pltpu


def _round_up(x, m):
    return ((x + m - 1) // m) * m


def _cdiv(a, b):
    return -(-a // b)


def _decoder_kernel(x_ref, w_ref, b_ref, o_ref, acc_ref, *,
                    inv_l, l_true, tl, need_mask):
    # x_ref:   (TN, C, TL)  native layout, L on lanes
    # w_ref:   (C, K_pad)   f32, pre-transposed + pre-cast, VMEM-resident
    # b_ref:   (1, K_pad)   f32
    # o_ref:   (TN, K_pad)
    # acc_ref: (TN, C)      f32 scratch, resident across the L grid axis
    li = pl.program_id(1)

    @pl.when(li == 0)
    def _():
        acc_ref[...] = jnp.zeros_like(acc_ref)

    x = x_ref[...].astype(jnp.float32)
    if need_mask:
        # Ragged L tail: out-of-bounds lanes of the last tile hold unspecified
        # data -> zero them before accumulating (compile-time-disabled otherwise).
        lane = lax.broadcasted_iota(jnp.int32, x.shape, 2)
        x = jnp.where(li * tl + lane < l_true, x, 0.0)

    # Sum-pool over this L tile: the cross-lane reduce runs on the XLU slot,
    # which is otherwise idle and hidden under the streaming DMA of the next tile.
    acc_ref[...] += jnp.sum(x, axis=-1)

    @pl.when(li == pl.num_programs(1) - 1)
    def _():
        # MXU epilogue: (TN, C) @ (C, K_pad); the 1/L mean scale is folded here.
        out = jnp.dot(acc_ref[...], w_ref[...],
                      preferred_element_type=jnp.float32)
        out = out * inv_l + b_ref[...]
        o_ref[...] = out.astype(o_ref.dtype)


def simple_cnn_decoder(x, weight, bias, *, tn=None, tl=None):
    """AdaptiveAvgPool1d(1) -> flatten -> Linear  (PyTorch SimpleCNNDecoder.forward).

    x:      (N, C, L)       activations (f32 or bf16), read in native layout
    weight: (n_classes, C)  PyTorch Linear weight
    bias:   (n_classes,)
    returns (N, n_classes) in x.dtype
    """
    N, C, L = x.shape
    K = weight.shape[0]
    itemsize = jnp.dtype(x.dtype).itemsize

    K_pad = _round_up(K, 128)          # lane-dense output stores

    # Weight/bias are tiny: transpose to (C, K_pad) and cast to f32 once in the
    # wrapper so the epilogue needs no transpose and no per-call cast temporary.
    w_p = jnp.pad(jnp.transpose(weight).astype(jnp.float32),
                  ((0, 0), (0, K_pad - K)))
    b_p = jnp.pad(bias.astype(jnp.float32), (0, K_pad - K)).reshape(1, K_pad)

    # ---- batch tile: multiple of 8 (or == N when N <= 8); keep >= 2 blocks on
    #      the "parallel" axis when N allows so both v7x TensorCores get work.
    if tn is not None:
        TN = tn
    elif N <= 8:
        TN = N
    else:
        TN = min(_round_up(N, 8), 256)
        if _cdiv(N, TN) < 2:
            TN = _round_up(_cdiv(N, 2), 8)
    grid_n = _cdiv(N, TN)
    N_pad = grid_n * TN                # output rows only; x itself is NOT padded

    # ---- VMEM budget: count the resident f32 weight + bias, the (2x-buffered)
    #      output block and the f32 accumulator, then size the streamed x tile
    #      from what is left under an explicit 48 MiB limit (safely below v7x's
    #      64 MiB physical VMEM; well inside v5e/v6e's 128 MiB).
    VMEM_CAP = 48 * 1024 * 1024
    resident = ((C * K_pad + K_pad) * 4          # f32 weight + bias
                + 2 * TN * K_pad * itemsize      # output block (double-buffered)
                + TN * C * 4)                    # f32 accumulator scratch
    x_budget = min(12 * 1024 * 1024,
                   max(1 * 1024 * 1024, (VMEM_CAP - resident - (4 << 20)) // 2))
    # TODO(synk): for very large C the resident (C, K_pad) weight can dominate
    # VMEM; add a third (arbitrary) grid axis tiling C in that regime.

    # ---- L tile: L is on the lane axis, so TL must be a multiple of 128 or equal
    #      to L (full extent). Prefer a single full-extent tile when it fits.
    if tl is not None:
        TL = tl
    elif L <= 128 or TN * C * L * itemsize <= x_budget:
        TL = L
    else:
        TL = max(128, (x_budget // (TN * C * itemsize)) // 128 * 128)
    assert TL == L or TL % 128 == 0, "tl must equal L or be a multiple of 128"
    grid_l = _cdiv(L, TL)
    need_mask = (L % TL) != 0          # ragged L tail -> mask inside the kernel

    x_block_bytes = TN * C * TL * itemsize
    vmem_limit = int(min(max(2 * x_block_bytes + resident + (2 << 20), 32 << 20),
                         VMEM_CAP))

    grid = (grid_n, grid_l)
    inv_l = 1.0 / float(L)

    flops = N_pad * C * L + 2 * N_pad * C * K_pad
    bytes_accessed = (x.size * itemsize
                      + w_p.size * 4 + b_p.size * 4
                      + N_pad * K_pad * itemsize)

    out = pl.pallas_call(
        functools.partial(_decoder_kernel, inv_l=inv_l, l_true=L, tl=TL,
                          need_mask=need_mask),
        out_shape=jax.ShapeDtypeStruct((N_pad, K_pad), x.dtype),
        grid_spec=pltpu.PrefetchScalarGridSpec(
            num_scalar_prefetch=0,
            grid=grid,
            in_specs=[
                # x in native (N, C, L) layout: long contiguous, lane-dense DMA.
                pl.BlockSpec((TN, C, TL), lambda i, l: (i, 0, l)),
                # weight / bias: constant index_map -> stay VMEM-resident.
                pl.BlockSpec((C, K_pad), lambda i, l: (0, 0)),
                pl.BlockSpec((1, K_pad), lambda i, l: (0, 0)),
            ],
            # Output block constant across the L axis -> resident tile, written
            # once in the l == last epilogue.
            out_specs=pl.BlockSpec((TN, K_pad), lambda i, l: (i, 0)),
            scratch_shapes=[pltpu.VMEM((TN, C), jnp.float32)],
        ),
        compiler_params=pltpu.CompilerParams(
            dimension_semantics=("parallel", "arbitrary"),
            vmem_limit_bytes=vmem_limit,
        ),
        cost_estimate=pl.CostEstimate(
            flops=flops, transcendentals=0, bytes_accessed=bytes_accessed),
    )(x, w_p, b_p)

    return out[:N, :K]


if __name__ == "__main__":
    key = jax.random.PRNGKey(0)
    kx, kw, kb, kx2 = jax.random.split(key, 4)

    # Shapes consistent with the module's forward:
    #   x: (batch, in_features, seq_len) -> AdaptiveAvgPool1d(1) -> Linear(in_features, n_classes)
    batch, in_features, seq_len, n_classes = 2, 32, 16, 8

    x = jax.random.normal(kx, (batch, in_features, seq_len), dtype=jnp.float32)

    # Deterministic PyTorch-style Linear init: uniform(-1/sqrt(fan_in), 1/sqrt(fan_in))
    bound = 1.0 / (in_features ** 0.5)
    weight = jax.random.uniform(kw, (n_classes, in_features),
                                minval=-bound, maxval=bound, dtype=jnp.float32)
    bias = jax.random.uniform(kb, (n_classes,),
                              minval=-bound, maxval=bound, dtype=jnp.float32)

    # Pure-JAX reference
    ref = jnp.mean(x, axis=-1) @ weight.T + bias

    # 1) small shapes, single full-extent L tile
    out = simple_cnn_decoder(x, weight, bias)
    jax.block_until_ready(out)
    assert out.shape == (batch, n_classes)
    assert jnp.allclose(out, ref, atol=1e-4, rtol=1e-4), "mismatch (default tiling)"

    # 2) multi-step L reduction with a masked ragged tail + 2 parallel batch blocks
    batch2, seq_len2 = 10, 300
    x2 = jax.random.normal(kx2, (batch2, in_features, seq_len2), dtype=jnp.float32)
    ref2 = jnp.mean(x2, axis=-1) @ weight.T + bias
    out2 = simple_cnn_decoder(x2, weight, bias, tl=128)   # 3 L tiles, last masked
    jax.block_until_ready(out2)
    assert out2.shape == (batch2, n_classes)
    assert jnp.allclose(out2, ref2, atol=1e-4, rtol=1e-4), "mismatch (tiled reduction)"

    # 3) same input, default tiling (single full-extent L tile, L=300 not mult of 128)
    out3 = simple_cnn_decoder(x2, weight, bias)
    jax.block_until_ready(out3)
    assert jnp.allclose(out3, ref2, atol=1e-4, rtol=1e-4), "mismatch (auto tiling, L=300)"

    print("KERNEL_OK")
</pallas_src>

<mosaic_0001>
module attributes {stable_mosaic.version = 11 : i64} {
  func.func @_decoder_kernel(%arg0: i32, %arg1: i32, %arg2: memref<2x32x16xf32, #tpu.memory_space<vmem>>, %arg3: memref<32x128xf32, #tpu.memory_space<vmem>>, %arg4: memref<1x128xf32, #tpu.memory_space<vmem>>, %arg5: memref<2x128xf32, #tpu.memory_space<vmem>>, %arg6: memref<2x32xf32, #tpu.memory_space<vmem>>) attributes {dimension_semantics = [#tpu.dimension_semantics<parallel>, #tpu.dimension_semantics<arbitrary>], iteration_bounds = array<i64: 1, 1>, scalar_prefetch = 0 : i64, scratch_operands = 1 : i64, tpu.core_type = #tpu.core_type<tc>, window_params = [{transform_indices = @transform_0, window_bounds = array<i64: 2, 32, 16>}, {pipeline_mode = #tpu.pipeline_mode<synchronous>, transform_indices = @transform_1, window_bounds = array<i64: 32, 128>}, {pipeline_mode = #tpu.pipeline_mode<synchronous>, transform_indices = @transform_2, window_bounds = array<i64: 1, 128>}, {transform_indices = @transform_3, window_bounds = array<i64: 2, 128>}]} {
    %c0_i32 = arith.constant 0 : i32
    %0 = arith.cmpi eq, %arg1, %c0_i32 : i32
    %1 = arith.extui %0 : i1 to i32
    %c0_i32_0 = arith.constant 0 : i32
    %2 = arith.cmpi ne, %1, %c0_i32_0 : i32
    scf.if %2 {
      %cst_9 = arith.constant 0.000000e+00 : f32
      %11 = vector.broadcast %cst_9 : f32 to vector<2x32xf32>
      %c0_10 = arith.constant 0 : index
      %c0_11 = arith.constant 0 : index
      %12 = vector.load %arg6[%c0_10, %c0_11] : memref<2x32xf32, #tpu.memory_space<vmem>>, vector<2x32xf32>
      tpu.vector_store %arg6[%c0_10, %c0_11], %11 {strides = array<i32>} : memref<2x32xf32, #tpu.memory_space<vmem>>, vector<2x32xf32>,
    } else {
    }
    %c0 = arith.constant 0 : index
    %c0_1 = arith.constant 0 : index
    %c0_2 = arith.constant 0 : index
    %3 = vector.load %arg2[%c0, %c0_1, %c0_2] : memref<2x32x16xf32, #tpu.memory_space<vmem>>, vector<2x32x16xf32>
    %c0_3 = arith.constant 0 : index
    %c0_4 = arith.constant 0 : index
    %4 = vector.load %arg6[%c0_3, %c0_4] : memref<2x32xf32, #tpu.memory_space<vmem>>, vector<2x32xf32>
    %cst = arith.constant dense<0.000000e+00> : vector<2x32xf32>
    %5 = vector.multi_reduction <add>, %3, %cst [2] : vector<2x32x16xf32> to vector<2x32xf32>
    %6 = arith.addf %4, %5 : vector<2x32xf32>
    %c0_5 = arith.constant 0 : index
    %c0_6 = arith.constant 0 : index
    %7 = vector.load %arg6[%c0_5, %c0_6] : memref<2x32xf32, #tpu.memory_space<vmem>>, vector<2x32xf32>
    tpu.vector_store %arg6[%c0_5, %c0_6], %6 {strides = array<i32>} : memref<2x32xf32, #tpu.memory_space<vmem>>, vector<2x32xf32>,
    %c0_i32_7 = arith.constant 0 : i32
    %8 = arith.cmpi eq, %arg1, %c0_i32_7 : i32
    %9 = arith.extui %8 : i1 to i32
    %c0_i32_8 = arith.constant 0 : i32
    %10 = arith.cmpi ne, %9, %c0_i32_8 : i32
    scf.if %10 {
      %c0_9 = arith.constant 0 : index
      %c0_10 = arith.constant 0 : index
      %11 = vector.load %arg6[%c0_9, %c0_10] : memref<2x32xf32, #tpu.memory_space<vmem>>, vector<2x32xf32>
      %c0_11 = arith.constant 0 : index
      %c0_12 = arith.constant 0 : index
      %12 = vector.load %arg3[%c0_11, %c0_12] : memref<32x128xf32, #tpu.memory_space<vmem>>, vector<32x128xf32>
      %cst_13 = arith.constant dense<0.000000e+00> : vector<2x128xf32>
      %13 = tpu.matmul %11, %12, %cst_13 {dimension_numbers = #tpu.dot_dimension_numbers<[1], [0], [0], [1], [0, 0, 1, 1], [], []>} : vector<2x32xf32>, vector<32x128xf32>, vector<2x128xf32> -> vector<2x128xf32>
      %cst_14 = arith.constant 6.250000e-02 : f32
      %14 = vector.broadcast %cst_14 : f32 to vector<2x128xf32>
      %15 = arith.mulf %13, %14 : vector<2x128xf32>
      %c0_15 = arith.constant 0 : index
      %c0_16 = arith.constant 0 : index
      %16 = vector.load %arg4[%c0_15, %c0_16] : memref<1x128xf32, #tpu.memory_space<vmem>>, vector<1x128xf32>
      %17 = vector.broadcast %16 : vector<1x128xf32> to vector<2x128xf32>
      %18 = arith.addf %15, %17 : vector<2x128xf32>
      %c0_17 = arith.constant 0 : index
      %c0_18 = arith.constant 0 : index
      %19 = vector.load %arg5[%c0_17, %c0_18] : memref<2x128xf32, #tpu.memory_space<vmem>>, vector<2x128xf32>
      tpu.vector_store %arg5[%c0_17, %c0_18], %18 {strides = array<i32>} : memref<2x128xf32, #tpu.memory_space<vmem>>, vector<2x128xf32>,
    } else {
    }
    return
  }
  func.func @transform_0(%arg0: i32, %arg1: i32) -> (i32, i32, i32) {
    %c0_i32 = arith.constant 0 : i32
    %c0_i32_0 = arith.constant 0 : i32
    return %arg0, %c0_i32, %arg1 : i32, i32, i32
  }
  func.func @transform_1(%arg0: i32, %arg1: i32) -> (i32, i32) {
    %c0_i32 = arith.constant 0 : i32
    %c0_i32_0 = arith.constant 0 : i32
    %c0_i32_1 = arith.constant 0 : i32
    return %c0_i32, %c0_i32_0 : i32, i32
  }
  func.func @transform_2(%arg0: i32, %arg1: i32) -> (i32, i32) {
    %c0_i32 = arith.constant 0 : i32
    %c0_i32_0 = arith.constant 0 : i32
    %c0_i32_1 = arith.constant 0 : i32
    return %c0_i32, %c0_i32_0 : i32, i32
  }
  func.func @transform_3(%arg0: i32, %arg1: i32) -> (i32, i32) {
    %c0_i32 = arith.constant 0 : i32
    %c0_i32_0 = arith.constant 0 : i32
    return %arg0, %c0_i32 : i32, i32
  }
}

</mosaic_0001>

<bundles_post_ra>
// kernel: tpu_custom_call.1
= control target key start
LH: loop header
LB: loop body
LE: loop exit
PB: predicated region body
PF: predicated region fallthrough
CT: control target
= control target key end

     0   :  { %vm30_vm0 = vcmask 130048   ;;  %s250_s0 = inlined_call_operand.vmem [shape: f32[2,32,16], index: 0, kind: input, shape index: {}]   ;;  %s251_s1 = inlined_call_operand.vmem [shape: f32[32,128], index: 1, kind: input, shape index: {}]   ;;  %s252_s2 = inlined_call_operand.vmem [shape: f32[1,128], index: 2, kind: input, shape index: {}]   ;;  %s253_s3 = inlined_call_operand.hbm [shape: f32[2,128], index: 3, kind: output, shape index: {}]  }
   0x1   :  { %v25_v0 = vld [vmem:[%s250_s0 + $0x20] sm:$0xff]  ;;  %v23_v2 = vld [vmem:[%s250_s0 + $0x10] sm:$0xff] }
   0x2   :  { %v21_v1 = vld [vmem:[%s250_s0] sm:$0xff]  ;;  %v43_v3 = vsel %vm30_vm0, %v25_v0, 0.0  ;;  %v37_v5 = vsel %vm30_vm0, %v23_v2, 0.0 }
   0x3   :  { %v31_v4 = vsel %vm30_vm0, %v21_v1, 0.0  ;;  %44 = vadd.xlane.f32.xlu1 %v43_v3  ;;  %38 = vadd.xlane.f32.xlu2 %v37_v5 }
   0x4   :  { %32 = vadd.xlane.f32.xlu0 %v31_v4 }
   0x5   :  { %8 = vsyncpa [#allocation4], 0  ;;  %v26_v6 = vld [vmem:[%s250_s0 + $0x28] sm:$0xff]  ;;  %v27_v8 = vld [vmem:[%s250_s0 + $0x30] sm:$0xff]  ;;  %vm19_vm1 = vcmask 254976   ;;  %v176_v16 = vmov 0.0   ;;  %v63_v23 = vlaneseq }
   0x6   :  { %v22_v7 = vld [vmem:[%s250_s0 + $0x8] sm:$0xff]  ;;  %v46_v9 = vsel %vm30_vm0, %v26_v6, 0.0  ;;  %v49_v11 = vsel %vm30_vm0, %v27_v8, 0.0  ;;  %v28_v12 = vld [vmem:[%s250_s0 + $0x38] sm:$0xff]  ;;  %20 = vst.msk [vmem:[#allocation2] sm:$0x3] %vm19_vm1, %v176_v16 }
   0x7   :  { %v34_v10 = vsel %vm30_vm0, %v22_v7, 0.0  ;;  %v24_v13 = vld [vmem:[%s250_s0 + $0x18] sm:$0xff]  ;;  %v52_v14 = vsel %vm30_vm0, %v28_v12, 0.0  ;;  %v97_v18 = vld [vmem:[%s251_s1 + $0x10] sm:$0xff]  ;;  %v96_v19 = vld [vmem:[%s251_s1 + $0x8] sm:$0xff]  ;;  %v64_v25 = vand.u32 127, %v63_v23 }
   0x8   :  { %v40_v15 = vsel %vm30_vm0, %v24_v13, 0.0  ;;  %v98_v17 = vld [vmem:[%s251_s1 + $0x18] sm:$0xff]  ;;  %v95_v20 = vld [vmem:[%s251_s1] sm:$0xff]  ;;  %vm68_vm2 = vcmask 130112   ;;  %vm72_vm3 = vcmask 195712   ;;  %vm76_vm4 = vcmask 261312  }
   0x9   :  { %115 = vmatpush.msra.mxu0 %v98_v17  ;;  %v66_v26 = vadd.s32 4294967288, %v64_v25  ;;  %v70_v32 = vadd.s32 4294967280, %v64_v25  ;;  %v74_v35 = vadd.s32 4294967272, %v64_v25  ;;  %vm85_vm5 = vcmask 1041409   ;;  %v149_v52 = vld [vmem:[%s252_s2] ss:$0 sm:$0xff] }
   0xa   :  { %vm99_vm6 = vcmask 261120   ;;  %s177_s9 = smov [#allocation3]   ;;  %s137_s13 = sshll.u32 %s253_s3, 4  ;;  %s138_s13 = int_to_ptr.hbm [resolvable:$true] %s137_s13 }
   0xb   :  { %47 = vadd.xlane.f32.xlu1 %v46_v9  ;;  %50 = vadd.xlane.f32.xlu2 %v49_v11  ;;  %s135_s10 = sshll.u32 %s177_s9, 4  ;;  %s136_s10 = int_to_ptr.vmem [resolvable:$true] %s135_s10 }
   0xc   :  { %35 = vadd.xlane.f32.xlu0 %v34_v10  ;;  %116 = vmatpush.msra.mxu0 %v97_v18 }
   0xd   :  { %v29_v46 = vld [vmem:[#allocation2] sm:$0x3] }
   0xe   :  { %117 = vmatpush.msra.mxu0 %v96_v19 }
  0x10   :  { %118 = vmatpush.msra.mxu0 %v95_v20 }
  0x13   :  { %53 = vadd.xlane.f32.xlu1 %v52_v14 }
  0x14   :  { %41 = vadd.xlane.f32.xlu0 %v40_v15 }
  0x76   :  { %v45_v21 = vpop.xlane.xlu1 %44  ;;  %v39_v24 = vpop.xlane.xlu2 %38 }
  0x77   :  { %v33_v22 = vpop.xlane.xlu0 %32  ;;  %v78_v33 = vperm.slane %v45_v21, %v64_v25  ;;  %v71_v39 = vperm.slane %v39_v24, %v70_v32 }
  0x78   :  { %v65_v34 = vperm.slane %v33_v22, %v64_v25 }
  0x7e   :  { %v48_v27 = vpop.xlane.xlu1 %47  ;;  %v51_v31 = vpop.xlane.xlu2 %50 }
  0x7f   :  { %v36_v28 = vpop.xlane.xlu0 %35  ;;  %v79_v29 = vperm.slane %v48_v27, %v66_v26  ;;  %v81_v36 = vperm.slane %v51_v31, %v70_v32 }
  0x80   :  { %v67_v30 = vperm.slane %v36_v28, %v66_v26 }
  0x81   :  { %v80_v37 = vsel %vm68_vm2, %v79_v29, %v78_v33 }
  0x82   :  { %v69_v38 = vsel %vm68_vm2, %v67_v30, %v65_v34  ;;  %v82_v44 = vsel %vm72_vm3, %v81_v36, %v80_v37 }
  0x83   :  { %v73_v45 = vsel %vm72_vm3, %v71_v39, %v69_v38 }
  0x86   :  { %v54_v40 = vpop.xlane.xlu1 %53 }
  0x87   :  { %v42_v41 = vpop.xlane.xlu0 %41  ;;  %v83_v42 = vperm.slane %v54_v40, %v74_v35 }
  0x88   :  { %v75_v43 = vperm.slane %v42_v41, %v74_v35 }
  0x89   :  { %v84_v47 = vsel %vm76_vm4, %v83_v42, %v82_v44 }
  0x8a   :  { %v77_v48 = vsel %vm76_vm4, %v75_v43, %v73_v45 }
  0x8b   :  { %v86_v49 = vsel %vm85_vm5, %v84_v47, %v77_v48 }
  0x8c   :  { %v88_v50 = vadd.f32 %v86_v49, %v29_v46 }
  0x8e   :  { %90 = vst.msk [vmem:[#allocation2] sm:$0x3] %vm19_vm1, %v88_v50 }
  0x95   :  { %v94_v51 = vld [vmem:[#allocation2] sm:$0x3] }
  0x96   :  { %146 = vmatmul.msk.f32.vlgmr.msra.gmra.mxu0 %vm99_vm6, %v94_v51 }
 0x113   :  { %v120_v53 = vpop.f32.mrf.mxu0 }
 0x114   :  { %v123_v54 = vmul.f32 0.0625, %v120_v53 }
 0x116   :  { %v128_v55 = vadd.f32 %v149_v52, %v123_v54 }
 0x118   :  { %129 = vst [vmem:[#allocation3] sm:$0x3] %v128_v55 }
 0x119   :  { %140 = dma.vmem_to_hbm [thread:$0]  %s136_s10, 32, %s138_s13, [#allocation4]  }
 0x11a   :  { %174 = dma.done.wait [#allocation4], 32  }
 0x11b   :  { %175 = vsyncadd [#allocation4], 4294967264 }
 0x11c   :  { %145 = vsyncpa [#allocation4], 1 }

</bundles_post_ra>
